<compile_context>
chip_gen: v7x
topology: tpu7x:2x2x1
jax: 0.10.0
libtpu: 0.0.40
codegen_flags: <defaults>
</compile_context>

<pallas_src>
import math

import jax
import jax.numpy as jnp
import numpy as np
from jax.experimental import pallas as pl
from jax.experimental.pallas import tpu as pltpu


def _pos_emb_kernel(cc_ref, sc_ref, cr_ref, sr_ref, o_ref):
    """out[g, s, l] = cos(row_angle[g, l] + col_angle[s, l])
                    = cos_row*cos_col - sin_row*sin_col   (2 mul + 1 sub + cast)."""
    o_ref[...] = (
        cr_ref[...] * cc_ref[...] - sr_ref[...] * sc_ref[...]
    ).astype(o_ref.dtype)


def _pick_block_groups(hg, bytes_per_group,
                       max_block_bytes=4 << 20, min_block_bytes=512 << 10):
    """Rows-of-groups per block: large blocks (amortize ~0.35us/step), but prefer
    >= 4 grid steps (v7x megacore + writeback pipelining) when blocks stay big."""
    tg = max(1, min(hg, max_block_bytes // max(bytes_per_group, 1)))
    tg4 = pl.cdiv(hg, 4)
    if tg4 * bytes_per_group >= min_block_bytes:
        tg = min(tg, tg4)
    return tg


def position_embedding_2d(x, dim, h, w, scale=1.0, base_size=None):
    """JAX/Pallas equivalent of PositionEmbedding2D.forward(x, h, w, scale, base_size)."""
    assert dim % 4 == 0, "dim must be divisible by 4"
    quarter = dim // 4
    half = dim // 2
    dtype = x.dtype

    # ---- trace-time constants (float64) ------------------------------------
    inv_freq = 1.0 / (10000.0 ** (np.arange(0, half, 2, dtype=np.float64) / half))
    h_mult = (1.0 / scale) * ((base_size / w) if base_size is not None else 1.0)
    w_mult = (1.0 / scale) * ((base_size / h) if base_size is not None else 1.0)

    # ---- lane-dense layout selection ---------------------------------------
    L = (dim * 128) // math.gcd(dim, 128)          # lcm(dim, 128)
    if (w * dim) % L == 0:
        R = L // dim                                # positions packed per lane group
        C = (w * dim) // L                          # lane groups per image row
    else:
        # TODO(synk): truly irregular dims stay lane-sparse (masked stores);
        # correctness is unaffected.
        L, R, C = dim, 1, w

    # Sublane packing: fold G image rows so S = G*C is a multiple of 8.
    g0 = 8 // math.gcd(C, 8)
    G = g0 if h % g0 == 0 else 1
    HG = h // G
    S = G * C

    # ---- angle tables (float64 sin/cos at trace time) ----------------------
    lane = np.arange(L)
    f = lane % dim                                   # feature index (lane-only by construction)
    q = f // quarter                                 # 0=sin_col 1=cos_col 2=sin_row 3=cos_row
    k = f % quarter
    freq = inv_freq[k]
    is_h = q < 2
    phase = np.where((q % 2) == 0, -np.pi / 2.0, 0.0)        # sin(x) = cos(x - pi/2)
    col_mult = np.where(is_h, freq * h_mult, 0.0)            # multiplies image column
    row_mult = np.where(is_h, 0.0, freq * w_mult)            # multiplies image row

    s = np.arange(S)
    xcol = (s % C)[:, None] * R + (lane // dim)[None, :]     # (S, L) image column
    g_in = (s // C)[:, None]                                 # row offset inside a group
    col_angle = (xcol * col_mult[None, :]
                 + g_in * row_mult[None, :]
                 + phase[None, :])                           # (S, L)
    row_angle = (np.arange(HG, dtype=np.float64)[:, None] * G) * row_mult[None, :]  # (HG, L)

    cos_col = jnp.asarray(np.cos(col_angle).reshape(1, S, L), jnp.float32)
    sin_col = jnp.asarray(np.sin(col_angle).reshape(1, S, L), jnp.float32)
    cos_row = jnp.asarray(np.cos(row_angle).reshape(HG, 1, L), jnp.float32)
    sin_row = jnp.asarray(np.sin(row_angle).reshape(HG, 1, L), jnp.float32)

    # ---- tiling -------------------------------------------------------------
    itemsize = jnp.dtype(dtype).itemsize
    tg = _pick_block_groups(HG, S * L * itemsize)
    grid = (pl.cdiv(HG, tg),)

    col_spec = pl.BlockSpec((1, S, L), lambda i: (0, 0, 0))    # revisited -> no re-DMA
    row_spec = pl.BlockSpec((tg, 1, L), lambda i: (i, 0, 0))

    out = pl.pallas_call(
        _pos_emb_kernel,
        out_shape=jax.ShapeDtypeStruct((HG, S, L), dtype),
        grid=grid,
        in_specs=[col_spec, col_spec, row_spec, row_spec],
        out_specs=pl.BlockSpec((tg, S, L), lambda i: (i, 0, 0)),
        compiler_params=pltpu.CompilerParams(
            dimension_semantics=("parallel",),
            vmem_limit_bytes=32 * 1024 * 1024,
        ),
        cost_estimate=pl.CostEstimate(
            flops=3 * h * w * dim,                 # 2 mul + 1 sub per element
            transcendentals=0,                     # all sin/cos folded at trace time
            bytes_accessed=h * w * dim * itemsize + (2 * S * L + 2 * HG * L) * 4,
        ),
    )(cos_col, sin_col, cos_row, sin_row)

    # (HG, S, L) has the same row-major bytes as (1, h*w, dim); reshape is free.
    return out.reshape(1, h * w, dim)


def _reference(dtype, dim, h, w, scale=1.0, base_size=None):
    """Pure numpy (float64) reproduction of the torch module, for verification."""
    half = dim // 2
    inv_freq = 1.0 / 10000 ** (np.arange(0, half, 2).astype(np.float64) / half)
    grid_h = np.arange(h, dtype=np.float64) / scale
    grid_w = np.arange(w, dtype=np.float64) / scale
    if base_size is not None:
        grid_h = grid_h * (base_size / h)
        grid_w = grid_w * (base_size / w)
    GH, GW = np.meshgrid(grid_w, grid_h, indexing="ij")  # each (w, h)
    gh = GH.T.reshape(-1)
    gw = GW.T.reshape(-1)

    def sincos(t):
        out = np.einsum("i,d->id", t, inv_freq)
        return np.concatenate([np.sin(out), np.cos(out)], axis=-1)

    emb = np.concatenate([sincos(gh), sincos(gw)], axis=-1)[None]
    return emb.astype(dtype)


if __name__ == "__main__":
    key = jax.random.PRNGKey(0)
    # x is NCHW; only its dtype (and device) matter, as in the torch module.
    B, Cc, H, W = 2, 4, 16, 16
    dim = 32
    x = jax.random.normal(key, (B, Cc, H, W), dtype=jnp.float32)

    # 1) lane-folded + sublane-folded path (dim=32 -> C=4, G=2, S=8)
    emb = jax.block_until_ready(position_embedding_2d(x, dim=dim, h=H, w=W))
    ref = _reference(np.float32, dim, H, W)
    assert emb.shape == (1, H * W, dim), emb.shape
    np.testing.assert_allclose(np.asarray(emb), ref, atol=5e-5, rtol=1e-5)

    # 2) scale / base_size path
    emb2 = jax.block_until_ready(
        position_embedding_2d(x, dim=dim, h=H, w=W, scale=2.0, base_size=8)
    )
    ref2 = _reference(np.float32, dim, H, W, scale=2.0, base_size=8)
    np.testing.assert_allclose(np.asarray(emb2), ref2, atol=5e-5, rtol=1e-5)

    # 3) dim % 128 == 0 path (L = dim, no lane folding needed)
    emb3 = jax.block_until_ready(position_embedding_2d(x, dim=128, h=8, w=8))
    ref3 = _reference(np.float32, 128, 8, 8)
    assert emb3.shape == (1, 64, 128), emb3.shape
    np.testing.assert_allclose(np.asarray(emb3), ref3, atol=5e-5, rtol=1e-5)

    # 4) bf16 output dtype (f32 compute, single cast at the store)
    emb4 = jax.block_until_ready(
        position_embedding_2d(x.astype(jnp.bfloat16), dim=dim, h=H, w=W)
    )
    np.testing.assert_allclose(
        np.asarray(emb4, dtype=np.float32), ref, atol=8e-3, rtol=2e-2
    )

    # 5) generalized lane packing: dim=96 -> L = lcm(96,128) = 384, G=2
    emb5 = jax.block_until_ready(position_embedding_2d(x, dim=96, h=16, w=16))
    ref5 = _reference(np.float32, 96, 16, 16)
    assert emb5.shape == (1, 256, 96), emb5.shape
    np.testing.assert_allclose(np.asarray(emb5), ref5, atol=5e-5, rtol=1e-5)

    # 6) multi-step grid with a partial (non-divisor) last block: h=250
    emb6 = jax.block_until_ready(position_embedding_2d(x, dim=64, h=250, w=64))
    ref6 = _reference(np.float32, 64, 250, 64)
    assert emb6.shape == (1, 250 * 64, 64), emb6.shape
    np.testing.assert_allclose(np.asarray(emb6), ref6, atol=5e-5, rtol=1e-5)

    print("KERNEL_OK")
</pallas_src>

<mosaic_0001>
module attributes {stable_mosaic.version = 11 : i64} {
  func.func @_pos_emb_kernel(%arg0: i32, %arg1: memref<1x8x128xf32, #tpu.memory_space<vmem>>, %arg2: memref<1x8x128xf32, #tpu.memory_space<vmem>>, %arg3: memref<8x1x128xf32, #tpu.memory_space<vmem>>, %arg4: memref<8x1x128xf32, #tpu.memory_space<vmem>>, %arg5: memref<8x8x128xf32, #tpu.memory_space<vmem>>) attributes {dimension_semantics = [#tpu.dimension_semantics<parallel>], iteration_bounds = array<i64: 1>, scalar_prefetch = 0 : i64, scratch_operands = 0 : i64, tpu.core_type = #tpu.core_type<tc>, window_params = [{pipeline_mode = #tpu.pipeline_mode<synchronous>, transform_indices = @transform_0, window_bounds = array<i64: 1, 8, 128>}, {pipeline_mode = #tpu.pipeline_mode<synchronous>, transform_indices = @transform_1, window_bounds = array<i64: 1, 8, 128>}, {transform_indices = @transform_2, window_bounds = array<i64: 8, 1, 128>}, {transform_indices = @transform_3, window_bounds = array<i64: 8, 1, 128>}, {transform_indices = @transform_4, window_bounds = array<i64: 8, 8, 128>}]} {
    %c0 = arith.constant 0 : index
    %c0_0 = arith.constant 0 : index
    %c0_1 = arith.constant 0 : index
    %0 = vector.load %arg3[%c0, %c0_0, %c0_1] : memref<8x1x128xf32, #tpu.memory_space<vmem>>, vector<8x1x128xf32>
    %c0_2 = arith.constant 0 : index
    %c0_3 = arith.constant 0 : index
    %c0_4 = arith.constant 0 : index
    %1 = vector.load %arg1[%c0_2, %c0_3, %c0_4] : memref<1x8x128xf32, #tpu.memory_space<vmem>>, vector<1x8x128xf32>
    %2 = vector.broadcast %0 : vector<8x1x128xf32> to vector<8x8x128xf32>
    %3 = vector.broadcast %1 : vector<1x8x128xf32> to vector<8x8x128xf32>
    %4 = arith.mulf %2, %3 : vector<8x8x128xf32>
    %c0_5 = arith.constant 0 : index
    %c0_6 = arith.constant 0 : index
    %c0_7 = arith.constant 0 : index
    %5 = vector.load %arg4[%c0_5, %c0_6, %c0_7] : memref<8x1x128xf32, #tpu.memory_space<vmem>>, vector<8x1x128xf32>
    %c0_8 = arith.constant 0 : index
    %c0_9 = arith.constant 0 : index
    %c0_10 = arith.constant 0 : index
    %6 = vector.load %arg2[%c0_8, %c0_9, %c0_10] : memref<1x8x128xf32, #tpu.memory_space<vmem>>, vector<1x8x128xf32>
    %7 = vector.broadcast %5 : vector<8x1x128xf32> to vector<8x8x128xf32>
    %8 = vector.broadcast %6 : vector<1x8x128xf32> to vector<8x8x128xf32>
    %9 = arith.mulf %7, %8 : vector<8x8x128xf32>
    %10 = arith.subf %4, %9 : vector<8x8x128xf32>
    %c0_11 = arith.constant 0 : index
    %c0_12 = arith.constant 0 : index
    %c0_13 = arith.constant 0 : index
    %11 = vector.load %arg5[%c0_11, %c0_12, %c0_13] : memref<8x8x128xf32, #tpu.memory_space<vmem>>, vector<8x8x128xf32>
    tpu.vector_store %arg5[%c0_11, %c0_12, %c0_13], %10 {strides = array<i32>} : memref<8x8x128xf32, #tpu.memory_space<vmem>>, vector<8x8x128xf32>,
    return
  }
  func.func @transform_0(%arg0: i32) -> (i32, i32, i32) {
    %c0_i32 = arith.constant 0 : i32
    %c0_i32_0 = arith.constant 0 : i32
    %c0_i32_1 = arith.constant 0 : i32
    %c0_i32_2 = arith.constant 0 : i32
    return %c0_i32, %c0_i32_0, %c0_i32_1 : i32, i32, i32
  }
  func.func @transform_1(%arg0: i32) -> (i32, i32, i32) {
    %c0_i32 = arith.constant 0 : i32
    %c0_i32_0 = arith.constant 0 : i32
    %c0_i32_1 = arith.constant 0 : i32
    %c0_i32_2 = arith.constant 0 : i32
    return %c0_i32, %c0_i32_0, %c0_i32_1 : i32, i32, i32
  }
  func.func @transform_2(%arg0: i32) -> (i32, i32, i32) {
    %c0_i32 = arith.constant 0 : i32
    %c0_i32_0 = arith.constant 0 : i32
    %c0_i32_1 = arith.constant 0 : i32
    return %arg0, %c0_i32, %c0_i32_0 : i32, i32, i32
  }
  func.func @transform_3(%arg0: i32) -> (i32, i32, i32) {
    %c0_i32 = arith.constant 0 : i32
    %c0_i32_0 = arith.constant 0 : i32
    %c0_i32_1 = arith.constant 0 : i32
    return %arg0, %c0_i32, %c0_i32_0 : i32, i32, i32
  }
  func.func @transform_4(%arg0: i32) -> (i32, i32, i32) {
    %c0_i32 = arith.constant 0 : i32
    %c0_i32_0 = arith.constant 0 : i32
    %c0_i32_1 = arith.constant 0 : i32
    return %arg0, %c0_i32, %c0_i32_0 : i32, i32, i32
  }
}

</mosaic_0001>

<bundles_post_ra>
// kernel: tpu_custom_call.1
= control target key start
LH: loop header
LB: loop body
LE: loop exit
PB: predicated region body
PF: predicated region fallthrough
CT: control target
= control target key end

     0   :  { %9 = vsyncpa [#allocation3], 0  ;;  %s442_s0 = inlined_call_operand.hbm [shape: f32[1,8,128], index: 0, kind: input, shape index: {}]   ;;  %s443_s1 = inlined_call_operand.hbm [shape: f32[1,8,128], index: 1, kind: input, shape index: {}]   ;;  %s444_s2 = inlined_call_operand.hbm [shape: f32[8,1,128], index: 2, kind: input, shape index: {}]   ;;  %s445_s3 = inlined_call_operand.vmem [shape: f32[8,1,128], index: 3, kind: input, shape index: {}]   ;;  %s446_s4 = inlined_call_operand.hbm [shape: f32[8,8,128], index: 4, kind: output, shape index: {}]  }
   0x1   :  { %10 = vsyncpa [#allocation6], 0 }
   0x2   :  { %11 = vsyncpa [#allocation4], 0  ;;  %s337_s15 = smov [#allocation5]   ;;  %s338_s17 = smov [#allocation2]  }
   0x3   :  { %s28_s16 = sshll.u32 %s337_s15, 4  ;;  %s18_s18 = sshll.u32 %s338_s17, 4  ;;  %s29_s16 = int_to_ptr.vmem [resolvable:$true] %s28_s16  ;;  %s19_s18 = int_to_ptr.vmem [resolvable:$true] %s18_s18 }
   0x4   :  { %s243_s21 = scalar_lea.hbm %s443_s1, 128 }
   0x5   :  { %p244_p0 = scmp.ne.s32.totalorder %s443_s1, %s243_s21  ;;  %p247_p1 = scmp.lt.u32.totalorder %s243_s21, %s443_s1 }
   0x7   :  { %p249_p2 = pnand %p247_p1, %p244_p0 }
   0x9   :  { %252 = shalt.err (!%p249_p2)
}
   0xa   :  { %s253_s26 = scalar_lea.vmem %s29_s16, 128  ;;  %p258_p4 = scmp.lt.s32.totalorder %s29_s16, %s29_s16 }
   0xb   :  { %p254_p3 = scmp.ne.s32.totalorder %s29_s16, %s253_s26  ;;  %p259_p5 = scmp.lt.s32.totalorder %s253_s26, %s253_s26 }
   0xd   :  { %p260_p6 = por %p259_p5, %p258_p4 }
   0xf   :  { %p261_p7 = pnand %p260_p6, %p254_p3 }
  0x11   :  { %264 = shalt.err (!%p261_p7)
}
  0x12   :  { %31 = dma.hbm_to_vmem [thread:$0]  %s443_s1, 128, %s29_s16, [#allocation6]  }
  0x13   :  { %s265_s5 = scalar_lea.hbm %s442_s0, 128 }
  0x14   :  { %p266_p8 = scmp.ne.s32.totalorder %s442_s0, %s265_s5  ;;  %p269_p9 = scmp.lt.u32.totalorder %s265_s5, %s442_s0 }
  0x16   :  { %p271_p10 = pnand %p269_p9, %p266_p8 }
  0x18   :  { %274 = shalt.err (!%p271_p10)
}
  0x19   :  { %s275_s10 = scalar_lea.vmem %s19_s18, 128  ;;  %p280_p12 = scmp.lt.s32.totalorder %s19_s18, %s19_s18 }
  0x1a   :  { %p276_p11 = scmp.ne.s32.totalorder %s19_s18, %s275_s10  ;;  %p281_p13 = scmp.lt.s32.totalorder %s275_s10, %s275_s10 }
  0x1c   :  { %p282_p0 = por %p281_p13, %p280_p12 }
  0x1e   :  { %p283_p1 = pnand %p282_p0, %p276_p11 }
  0x20   :  { %286 = shalt.err (!%p283_p1)
}
  0x21   :  { %21 = dma.hbm_to_vmem [thread:$0]  %s442_s0, 128, %s19_s18, [#allocation3]  }
  0x22   :  { %s339_s12 = smov [#allocation7]   ;;  %s287_s16 = scalar_lea.hbm %s444_s2, 128 }
  0x23   :  { %s37_s13 = sshll.u32 %s339_s12, 4  ;;  %p288_p2 = scmp.ne.s32.totalorder %s444_s2, %s287_s16  ;;  %s38_s13 = int_to_ptr.vmem [resolvable:$true] %s37_s13 }
  0x24   :  { %p291_p3 = scmp.lt.u32.totalorder %s287_s16, %s444_s2 }
  0x26   :  { %p293_p4 = pnand %p291_p3, %p288_p2 }
  0x28   :  { %296 = shalt.err (!%p293_p4)
}
  0x29   :  { %s297_s22 = scalar_lea.vmem %s38_s13, 128  ;;  %p302_p6 = scmp.lt.s32.totalorder %s38_s13, %s38_s13 }
  0x2a   :  { %p298_p5 = scmp.ne.s32.totalorder %s38_s13, %s297_s22  ;;  %p303_p7 = scmp.lt.s32.totalorder %s297_s22, %s297_s22 }
  0x2c   :  { %p304_p8 = por %p303_p7, %p302_p6 }
  0x2e   :  { %p305_p9 = pnand %p304_p8, %p298_p5 }
  0x30   :  { %308 = shalt.err (!%p305_p9)
}
  0x31   :  { %s340_s0 = smov 16   ;;  %s341_s18 = smov 1  }
  0x32   :  { %43 = dma.hbm_to_vmem [thread:$0]  %s444_s2, 128, %s38_s13, [#allocation6], %s340_s0, %s340_s0, %s341_s18  }
  0x33   :  { %331 = dma.done.wait [#allocation3], 128  }
  0x34   :  { %332 = vsyncadd [#allocation3], 4294967168 }
  0x35   :  { %333 = dma.done.wait [#allocation6], 256  }
  0x36   :  { %334 = vsyncadd [#allocation6], 4294967040  ;;  %v219_v0 = vld [vmem:[#allocation7] ss:$0 sm:$0xff]  ;;  %v63_v1 = vld [vmem:[#allocation2] sm:$0xff]  ;;  %s342_s13 = smov [#allocation8]  }
  0x37   :  { %v227_v2 = vld [vmem:[%s445_s3] ss:$0 sm:$0xff]  ;;  %v112_v3 = vmul.f32 %v219_v0, %v63_v1  ;;  %v128_v4 = vld [vmem:[#allocation5] sm:$0xff]  ;;  %v220_v5 = vld [vmem:[#allocation7 + $0x1] ss:$0 sm:$0xff]  ;;  %s206_s14 = sshll.u32 %s342_s13, 4  ;;  %s207_s14 = int_to_ptr.vmem [resolvable:$true] %s206_s14 }
  0x38   :  { %v228_v6 = vld [vmem:[%s445_s3 + $0x1] ss:$0 sm:$0xff]  ;;  %v177_v7 = vmul.f32 %v227_v2, %v128_v4  ;;  %v113_v8 = vmul.f32 %v220_v5, %v63_v1  ;;  %v221_v10 = vld [vmem:[#allocation7 + $0x2] ss:$0 sm:$0xff]  ;;  %v229_v11 = vld [vmem:[%s445_s3 + $0x2] ss:$0 sm:$0xff]  ;;  %p314_p11 = scmp.lt.s32.totalorder %s207_s14, %s207_s14 }
  0x39   :  { %v178_v9 = vmul.f32 %v228_v6, %v128_v4  ;;  %v222_v12 = vld [vmem:[#allocation7 + $0x3] ss:$0 sm:$0xff]  ;;  %v114_v13 = vmul.f32 %v221_v10, %v63_v1  ;;  %v179_v14 = vmul.f32 %v229_v11, %v128_v4  ;;  %v230_v16 = vld [vmem:[%s445_s3 + $0x3] ss:$0 sm:$0xff]  ;;  %v223_v17 = vld [vmem:[#allocation7 + $0x4] ss:$0 sm:$0xff] }
  0x3a   :  { %v115_v15 = vmul.f32 %v222_v12, %v63_v1  ;;  %v231_v18 = vld [vmem:[%s445_s3 + $0x4] ss:$0 sm:$0xff]  ;;  %v185_v19 = vsub.f32 %v112_v3, %v177_v7  ;;  %v180_v21 = vmul.f32 %v230_v16, %v128_v4  ;;  %v116_v22 = vmul.f32 %v223_v17, %v63_v1  ;;  %v224_v23 = vld [vmem:[#allocation7 + $0x5] ss:$0 sm:$0xff]  ;;  %v232_v24 = vld [vmem:[%s445_s3 + $0x5] ss:$0 sm:$0xff] }
  0x3b   :  { %v186_v20 = vsub.f32 %v113_v8, %v178_v9  ;;  %v225_v25 = vld [vmem:[#allocation7 + $0x6] ss:$0 sm:$0xff]  ;;  %v187_v26 = vsub.f32 %v114_v13, %v179_v14  ;;  %v181_v27 = vmul.f32 %v231_v18, %v128_v4  ;;  %v117_v28 = vmul.f32 %v224_v23, %v63_v1  ;;  %v233_v30 = vld [vmem:[%s445_s3 + $0x6] ss:$0 sm:$0xff]  ;;  %v226_v31 = vld [vmem:[#allocation7 + $0x7] ss:$0 sm:$0xff] }
  0x3c   :  { %v182_v29 = vmul.f32 %v232_v24, %v128_v4  ;;  %v234_v32 = vld [vmem:[%s445_s3 + $0x7] ss:$0 sm:$0xff]  ;;  %193 = vst [vmem:[#allocation8] sm:$0xff] %v185_v19  ;;  %v188_v33 = vsub.f32 %v115_v15, %v180_v21  ;;  %v118_v34 = vmul.f32 %v225_v25, %v63_v1  ;;  %v183_v35 = vmul.f32 %v233_v30, %v128_v4  ;;  %s309_s3 = scalar_lea.vmem %s207_s14, 1024 }
  0x3d   :  { %194 = vst [vmem:[#allocation8 + $0x8] sm:$0xff] %v186_v20  ;;  %v119_v36 = vmul.f32 %v226_v31, %v63_v1  ;;  %195 = vst [vmem:[#allocation8 + $0x10] sm:$0xff] %v187_v26  ;;  %v189_v37 = vsub.f32 %v116_v22, %v181_v27  ;;  %v184_v39 = vmul.f32 %v234_v32, %v128_v4  ;;  %p310_p10 = scmp.ne.s32.totalorder %s207_s14, %s309_s3  ;;  %p315_p12 = scmp.lt.s32.totalorder %s309_s3, %s309_s3 }
  0x3e   :  { %v190_v38 = vsub.f32 %v117_v28, %v182_v29  ;;  %196 = vst [vmem:[#allocation8 + $0x18] sm:$0xff] %v188_v33  ;;  %v191_v40 = vsub.f32 %v118_v34, %v183_v35 }
  0x3f   :  { %197 = vst [vmem:[#allocation8 + $0x20] sm:$0xff] %v189_v37  ;;  %v192_v41 = vsub.f32 %v119_v36, %v184_v39  ;;  %p316_p13 = por %p315_p12, %p314_p11 }
  0x40   :  { %198 = vst [vmem:[#allocation8 + $0x28] sm:$0xff] %v190_v38  ;;  %199 = vst [vmem:[#allocation8 + $0x30] sm:$0xff] %v191_v40 }
  0x41   :  { %200 = vst [vmem:[#allocation8 + $0x38] sm:$0xff] %v192_v41  ;;  %p317_p0 = pnand %p316_p13, %p310_p10 }
  0x43   :  { %320 = shalt.err (!%p317_p0)
}
  0x44   :  { %s321_s17 = scalar_lea.hbm %s446_s4, 1024 }
  0x45   :  { %p322_p1 = scmp.ne.s32.totalorder %s446_s4, %s321_s17  ;;  %p325_p2 = scmp.lt.u32.totalorder %s321_s17, %s446_s4 }
  0x47   :  { %p327_p3 = pnand %p325_p2, %p322_p1 }
  0x49   :  { %330 = shalt.err (!%p327_p3)
}
  0x4a   :  { %s343_s0 = smov 128   ;;  %s344_s18 = smov 8  }
  0x4b   :  { %212 = dma.vmem_to_hbm [thread:$0]  %s207_s14, 1024, %s446_s4, [#allocation4], %s343_s0, %s343_s0, %s344_s18  }
  0x4c   :  { %335 = dma.done.wait [#allocation4], 1024  }
  0x4d   :  { %336 = vsyncadd [#allocation4], 4294966272 }
  0x4e   :  { %216 = vsyncpa [#allocation3], 1 }
  0x4f   :  { %217 = vsyncpa [#allocation6], 1 }
  0x50   :  { %218 = vsyncpa [#allocation4], 1 }

</bundles_post_ra>
